<compile_context>
chip_gen: v7x
topology: tpu7x:2x2x1
jax: 0.10.0
libtpu: 0.0.40
codegen_flags: <defaults>
</compile_context>

<pallas_src>
import math

import jax
import jax.numpy as jnp
from jax.experimental import pallas as pl
from jax.experimental.pallas import tpu as pltpu


# ---------------------------------------------------------------------------
# VMEM budgeting (generation aware: v5e/v6e have 128 MiB VMEM, v7x only 64)
# ---------------------------------------------------------------------------
def _vmem_budget():
    """Returns (block_budget_bytes, vmem_limit_bytes) for tile planning."""
    try:
        phys = int(pltpu.get_tpu_info().vmem_capacity_bytes)
    except Exception:
        phys = 64 * 1024 * 1024          # assume the smallest (v7x per-core VMEM)
    vmem_limit = min(phys // 2, 48 * 1024 * 1024)   # scoped limit we request
    return vmem_limit // 2, vmem_limit              # 2x headroom for compiler scratch


def _round_up(x, m):
    return (x + m - 1) // m * m


# ---------------------------------------------------------------------------
# Fused kernel 1: linear + swap of dims 1,2 (permute(0,2,1,3) / transpose(1,2))
# ---------------------------------------------------------------------------
def _fused_linear_swap12_kernel(x_ref, w_ref, o_ref):
    """x_ref: (bb, S, tm, K); w_ref: (K, N); o_ref: (bb, tm, S*N).

    o[b, m, s*N:(s+1)*N] = x[b, s, m, :] @ w  -- the dims-1,2-swapped linear
    result, laid out lane-dense so the writeback is one unmasked full-width
    store per batch row instead of S masked 64-lane stores.
    """
    bb, S, tm, K = x_ref.shape
    # One MXU push over every row of this block (instead of bb*S tiny matmuls).
    y = jnp.dot(x_ref[...].reshape(bb * S * tm, K), w_ref[...],
                preferred_element_type=jnp.float32)           # (bb*S*tm, N)
    for b in range(bb):                                       # static unroll
        rows = [y[(b * S + s) * tm:(b * S + s + 1) * tm, :] for s in range(S)]
        o_ref[b] = jnp.concatenate(rows, axis=1).astype(o_ref.dtype)


def _plan_swap12(B, S, M, K, N, itemsize, budget):
    """Pick (batch_block bb, row_tile tm) for the fused swap-1,2 kernel."""
    align = max(8, 32 // max(1, itemsize))   # 8 for f32, 16 for bf16, 32 for int8

    def fits(bb, tm):
        # double-buffered x block + out block, plus double-buffered resident weight
        return 2 * itemsize * (bb * S * tm * (K + N) + K * N) <= budget

    cands = sorted({t for t in range(align, M + 1, align) if M % t == 0} | {M})
    tm = None
    for t in cands:
        if fits(1, t):
            tm = t
    if tm is None:
        return None
    m_tiles = M // tm
    # Fold batches together to minimise grid-step overhead, but keep >= 2
    # parallel steps when available so both v7x TensorCores get work.
    min_steps = min(2, B * m_tiles)
    bb = 1
    for cand in range(B, 0, -1):
        if B % cand == 0 and (B // cand) * m_tiles >= min_steps and fits(cand, tm):
            bb = cand
            break
    return bb, tm


def _fused_linear_swap12(x, w_kn, *, bb, tm, vmem_limit):
    """out[b, m, s*N + n] = sum_k x[b, s, m, k] * w_kn[k, n]  (shape (B, M, S*N))."""
    B, S, M, K = x.shape
    _, N = w_kn.shape
    itemsize = x.dtype.itemsize
    cost = pl.CostEstimate(
        flops=2 * B * S * M * K * N,
        transcendentals=0,
        bytes_accessed=(B * S * M * K + K * N + B * S * M * N) * itemsize)
    return pl.pallas_call(
        _fused_linear_swap12_kernel,
        out_shape=jax.ShapeDtypeStruct((B, M, S * N), x.dtype),
        grid_spec=pltpu.PrefetchScalarGridSpec(
            num_scalar_prefetch=0,
            grid=(B // bb, M // tm),
            in_specs=[
                pl.BlockSpec((bb, S, tm, K), lambda b, m: (b, 0, m, 0)),
                # Full (K, N) weight; constant index_map keeps it VMEM-resident.
                # TODO(synk): N-tile grid axis + pl.Buffered(1) for huge weights.
                pl.BlockSpec((K, N), lambda b, m: (0, 0)),
            ],
            out_specs=pl.BlockSpec((bb, tm, S * N), lambda b, m: (b, m, 0)),
        ),
        compiler_params=pltpu.CompilerParams(
            dimension_semantics=("parallel", "parallel"),
            vmem_limit_bytes=vmem_limit),
        cost_estimate=cost,
    )(x, w_kn)


# ---------------------------------------------------------------------------
# Fused kernel 2: linear + swap of the LAST TWO dims (transpose(-2, -1))
# ---------------------------------------------------------------------------
def _fused_linear_swaplast_kernel(x_ref, w_ref, o_ref):
    """x_ref: (lb, tm, K); w_ref: (K, N); o_ref: (lb, N, tm).

    o[l] = (x[l] @ w).T -- the transpose runs on the (otherwise idle) XLU slot
    on the VMEM tile and is written through a transposed output index_map, so
    no separate HBM round trip is paid for the permute.
    """
    lb, tm, K = x_ref.shape
    y = jnp.dot(x_ref[...].reshape(lb * tm, K), w_ref[...],
                preferred_element_type=jnp.float32)           # (lb*tm, N)
    for i in range(lb):                                       # static unroll
        o_ref[i] = y[i * tm:(i + 1) * tm, :].T.astype(o_ref.dtype)


def _plan_swaplast(L, M, K, N, itemsize, budget):
    """Pick (lead_block lb, row_tile tm) for the fused last-two-dims kernel."""
    def fits(lb, tm):
        return 2 * itemsize * (lb * tm * (K + N) + K * N) <= budget

    # tm becomes the lane dim of the transposed output block: full M or a
    # multiple of 128 (BlockSpec minor-dim constraint).
    cands = sorted({t for t in range(128, M, 128) if M % t == 0} | {M})
    tm = None
    for t in cands:
        if fits(1, t):
            tm = t
    if tm is None:
        return None
    m_tiles = M // tm
    min_steps = min(2, L * m_tiles)
    lb = 1
    for cand in range(L, 0, -1):
        if L % cand == 0 and (L // cand) * m_tiles >= min_steps and fits(cand, tm):
            lb = cand
            break
    return lb, tm


def _fused_linear_swaplast(x3, w_kn, *, lb, tm, vmem_limit):
    """out[l, n, m] = sum_k x3[l, m, k] * w_kn[k, n]  (shape (L, N, M))."""
    L, M, K = x3.shape
    _, N = w_kn.shape
    itemsize = x3.dtype.itemsize
    cost = pl.CostEstimate(
        flops=2 * L * M * K * N,
        transcendentals=0,
        bytes_accessed=(L * M * K + K * N + L * M * N) * itemsize)
    return pl.pallas_call(
        _fused_linear_swaplast_kernel,
        out_shape=jax.ShapeDtypeStruct((L, N, M), x3.dtype),
        grid_spec=pltpu.PrefetchScalarGridSpec(
            num_scalar_prefetch=0,
            grid=(L // lb, M // tm),
            in_specs=[
                pl.BlockSpec((lb, tm, K), lambda l, m: (l, m, 0)),
                pl.BlockSpec((K, N), lambda l, m: (0, 0)),
            ],
            out_specs=pl.BlockSpec((lb, N, tm), lambda l, m: (l, 0, m)),
        ),
        compiler_params=pltpu.CompilerParams(
            dimension_semantics=("parallel", "parallel"),
            vmem_limit_bytes=vmem_limit),
        cost_estimate=cost,
    )(x3, w_kn)


# ---------------------------------------------------------------------------
# Generic fallback: Pallas linear on flattened rows, permute done in XLA
# ---------------------------------------------------------------------------
def _linear_kernel(x_ref, w_ref, o_ref):
    o_ref[...] = jnp.dot(x_ref[...], w_ref[...],
                         preferred_element_type=jnp.float32).astype(o_ref.dtype)


def _pallas_linear(x2d, w_kn, *, budget, vmem_limit, tm_cap=2048):
    """x2d @ w_kn with x2d: (R, K), w_kn: (K, N). Ragged R via masked last block."""
    R, K = x2d.shape
    _, N = w_kn.shape
    itemsize = x2d.dtype.itemsize

    def fits(t):
        return 2 * itemsize * (t * (K + N) + K * N) <= budget

    tm = min(tm_cap, _round_up(R, 8))
    while tm > 8 and not fits(tm):
        tm -= 8
    # Prefer an exact divisor of R (no ragged tail) if it is not much smaller
    # than what the budget allows.
    for t in range(tm, 7, -8):
        if R % t == 0 and 2 * t >= tm:
            tm = t
            break
    grid_r = pl.cdiv(R, tm)   # ragged tail handled by masking (no jnp.pad copy)
    cost = pl.CostEstimate(flops=2 * R * K * N, transcendentals=0,
                           bytes_accessed=(R * K + K * N + R * N) * itemsize)
    return pl.pallas_call(
        _linear_kernel,
        out_shape=jax.ShapeDtypeStruct((R, N), x2d.dtype),
        grid_spec=pltpu.PrefetchScalarGridSpec(
            num_scalar_prefetch=0,
            grid=(grid_r,),
            in_specs=[pl.BlockSpec((tm, K), lambda i: (i, 0)),
                      pl.BlockSpec((K, N), lambda i: (0, 0))],
            out_specs=pl.BlockSpec((tm, N), lambda i: (i, 0)),
        ),
        compiler_params=pltpu.CompilerParams(
            dimension_semantics=("parallel",),
            vmem_limit_bytes=vmem_limit),
        cost_estimate=cost,
    )(x2d, w_kn)


# ---------------------------------------------------------------------------
# Module-equivalent wrapper
# ---------------------------------------------------------------------------
def linear_reshape_model(input_, other, reshape_dims=(0, 2, 1, 3),
                         call_function="permute"):
    """JAX/Pallas equivalent of LinearReshapeModel.forward.

    call_function: "permute"   -> torch.permute(linear, reshape_dims)
                   "transpose" -> torch.transpose(linear, *reshape_dims)
    """
    input_ = jnp.asarray(input_)
    other = jnp.asarray(other)
    ndim = input_.ndim
    N, K = other.shape
    assert input_.shape[-1] == K
    w_kn = other.T                       # one-time (N,K)->(K,N) MXU-friendly layout

    if call_function == "permute":
        perm = tuple(d % ndim for d in reshape_dims)
    else:                                # transpose: swap exactly two axes
        d0, d1 = (d % ndim for d in reshape_dims)
        p = list(range(ndim))
        p[d0], p[d1] = p[d1], p[d0]
        perm = tuple(p)

    itemsize = input_.dtype.itemsize
    budget, vmem_limit = _vmem_budget()

    # Fast path 1: 4-D input, permutation swaps dims 1,2 (attention-style
    # permute(0,2,1,3) / transpose(1,2)) -> fully fused linear + permute.
    if ndim == 4 and perm == (0, 2, 1, 3):
        B, S, M, _ = input_.shape
        plan = _plan_swap12(B, S, M, K, N, itemsize, budget)
        if plan is not None:
            bb, tm = plan
            out = _fused_linear_swap12(input_, w_kn, bb=bb, tm=tm,
                                       vmem_limit=vmem_limit)   # (B, M, S*N)
            return out.reshape(B, M, S, N)                      # contiguous, free

    # Fast path 2: permutation swaps the LAST TWO dims -> linear with the tile
    # transpose fused into the output index_map.
    if ndim >= 2 and perm == tuple(range(ndim - 2)) + (ndim - 1, ndim - 2):
        lead = input_.shape[:-2]
        M = input_.shape[-2]
        L = int(math.prod(lead))
        plan = _plan_swaplast(L, M, K, N, itemsize, budget)
        if plan is not None:
            lb, tm = plan
            out = _fused_linear_swaplast(input_.reshape(L, M, K), w_kn,
                                         lb=lb, tm=tm,
                                         vmem_limit=vmem_limit)  # (L, N, M)
            return out.reshape(*lead, N, M)

    # Generic path: Pallas linear, permute in XLA.
    # TODO(synk): permutations other than the two fused cases above pay one
    # extra HBM round trip for the jnp.transpose.
    y = _pallas_linear(input_.reshape(-1, K), w_kn,
                       budget=budget, vmem_limit=vmem_limit)
    y = y.reshape(*input_.shape[:-1], N)
    if perm == tuple(range(ndim)):
        return y
    return jnp.transpose(y, perm)


if __name__ == "__main__":
    key = jax.random.PRNGKey(0)
    k_in, k_w = jax.random.split(key)

    # input: (B, S, M, K) = (2, 8, 16, 32); other (weight): (N, K) = (64, 32)
    input_ = jax.random.normal(k_in, (2, 8, 16, 32), dtype=jnp.float32)
    other = jax.random.normal(k_w, (64, 32), dtype=jnp.float32)

    linear_ref = jnp.einsum("bsmk,nk->bsmn", input_, other)

    # 1) torch.permute(linear, (0, 2, 1, 3)) -> fused swap-dims-1/2 kernel.
    out_p = jax.block_until_ready(
        linear_reshape_model(input_, other, (0, 2, 1, 3), "permute"))
    ref_p = jnp.transpose(linear_ref, (0, 2, 1, 3))
    assert out_p.shape == (2, 16, 8, 64), out_p.shape
    assert jnp.allclose(out_p, ref_p, atol=1e-4, rtol=1e-4)

    # 2) torch.transpose(linear, 1, 2) -> same fused kernel path.
    out_t = jax.block_until_ready(
        linear_reshape_model(input_, other, (1, 2), "transpose"))
    assert out_t.shape == (2, 16, 8, 64), out_t.shape
    assert jnp.allclose(out_t, ref_p, atol=1e-4, rtol=1e-4)

    # 3) torch.permute(linear, (0, 1, 3, 2)) -> fused last-two-dims transpose.
    out_g = jax.block_until_ready(
        linear_reshape_model(input_, other, (0, 1, 3, 2), "permute"))
    ref_g = jnp.transpose(linear_ref, (0, 1, 3, 2))
    assert out_g.shape == (2, 8, 64, 16), out_g.shape
    assert jnp.allclose(out_g, ref_g, atol=1e-4, rtol=1e-4)

    # 4) torch.permute(linear, (2, 0, 1, 3)) -> generic (unfused) fallback path.
    out_f = jax.block_until_ready(
        linear_reshape_model(input_, other, (2, 0, 1, 3), "permute"))
    ref_f = jnp.transpose(linear_ref, (2, 0, 1, 3))
    assert out_f.shape == (16, 2, 8, 64), out_f.shape
    assert jnp.allclose(out_f, ref_f, atol=1e-4, rtol=1e-4)

    print("KERNEL_OK")
</pallas_src>

<mosaic_0001>
module attributes {stable_mosaic.version = 11 : i64} {
  func.func @_fused_linear_swap12_kernel(%arg0: i32, %arg1: i32, %arg2: memref<1x8x16x32xf32, #tpu.memory_space<vmem>>, %arg3: memref<32x64xf32, #tpu.memory_space<vmem>>, %arg4: memref<1x16x512xf32, #tpu.memory_space<vmem>>) attributes {dimension_semantics = [#tpu.dimension_semantics<parallel>, #tpu.dimension_semantics<parallel>], iteration_bounds = array<i64: 2, 1>, scalar_prefetch = 0 : i64, scratch_operands = 0 : i64, tpu.core_type = #tpu.core_type<tc>, window_params = [{transform_indices = @transform_0, window_bounds = array<i64: 1, 8, 16, 32>}, {pipeline_mode = #tpu.pipeline_mode<synchronous>, transform_indices = @transform_1, window_bounds = array<i64: 32, 64>}, {transform_indices = @transform_2, window_bounds = array<i64: 1, 16, 512>}]} {
    %c0 = arith.constant 0 : index
    %c0_0 = arith.constant 0 : index
    %c0_1 = arith.constant 0 : index
    %c0_2 = arith.constant 0 : index
    %0 = vector.load %arg2[%c0, %c0_0, %c0_1, %c0_2] : memref<1x8x16x32xf32, #tpu.memory_space<vmem>>, vector<1x8x16x32xf32>
    %1 = vector.shape_cast %0 : vector<1x8x16x32xf32> to vector<128x32xf32>
    %c0_3 = arith.constant 0 : index
    %c0_4 = arith.constant 0 : index
    %2 = vector.load %arg3[%c0_3, %c0_4] : memref<32x64xf32, #tpu.memory_space<vmem>>, vector<32x64xf32>
    %cst = arith.constant dense<0.000000e+00> : vector<128x64xf32>
    %3 = tpu.matmul %1, %2, %cst {dimension_numbers = #tpu.dot_dimension_numbers<[1], [0], [0], [1], [0, 0, 1, 1], [], []>} : vector<128x32xf32>, vector<32x64xf32>, vector<128x64xf32> -> vector<128x64xf32>
    %4 = vector.extract_strided_slice %3 {offsets = [0, 0], sizes = [16, 64], strides = [1, 1]} : vector<128x64xf32> to vector<16x64xf32>
    %5 = vector.extract_strided_slice %3 {offsets = [16, 0], sizes = [16, 64], strides = [1, 1]} : vector<128x64xf32> to vector<16x64xf32>
    %6 = vector.extract_strided_slice %3 {offsets = [32, 0], sizes = [16, 64], strides = [1, 1]} : vector<128x64xf32> to vector<16x64xf32>
    %7 = vector.extract_strided_slice %3 {offsets = [48, 0], sizes = [16, 64], strides = [1, 1]} : vector<128x64xf32> to vector<16x64xf32>
    %8 = vector.extract_strided_slice %3 {offsets = [64, 0], sizes = [16, 64], strides = [1, 1]} : vector<128x64xf32> to vector<16x64xf32>
    %9 = vector.extract_strided_slice %3 {offsets = [80, 0], sizes = [16, 64], strides = [1, 1]} : vector<128x64xf32> to vector<16x64xf32>
    %10 = vector.extract_strided_slice %3 {offsets = [96, 0], sizes = [16, 64], strides = [1, 1]} : vector<128x64xf32> to vector<16x64xf32>
    %11 = vector.extract_strided_slice %3 {offsets = [112, 0], sizes = [16, 64], strides = [1, 1]} : vector<128x64xf32> to vector<16x64xf32>
    %12 = tpu.concatenate %4, %5, %6, %7, %8, %9, %10, %11 in 1 : vector<16x64xf32>, vector<16x64xf32>, vector<16x64xf32>, vector<16x64xf32>, vector<16x64xf32>, vector<16x64xf32>, vector<16x64xf32>, vector<16x64xf32> -> vector<16x512xf32>
    %c0_5 = arith.constant 0 : index
    %c0_6 = arith.constant 0 : index
    %c0_7 = arith.constant 0 : index
    %13 = vector.load %arg4[%c0_5, %c0_6, %c0_7] : memref<1x16x512xf32, #tpu.memory_space<vmem>>, vector<1x16x512xf32>
    %14 = vector.shape_cast %13 : vector<1x16x512xf32> to vector<16x512xf32>
    %15 = vector.shape_cast %12 : vector<16x512xf32> to vector<1x16x512xf32>
    tpu.vector_store %arg4[%c0_5, %c0_6, %c0_7], %15 {strides = array<i32>} : memref<1x16x512xf32, #tpu.memory_space<vmem>>, vector<1x16x512xf32>,
    return
  }
  func.func @transform_0(%arg0: i32, %arg1: i32) -> (i32, i32, i32, i32) {
    %c0_i32 = arith.constant 0 : i32
    %c0_i32_0 = arith.constant 0 : i32
    %c0_i32_1 = arith.constant 0 : i32
    return %arg0, %c0_i32, %arg1, %c0_i32_0 : i32, i32, i32, i32
  }
  func.func @transform_1(%arg0: i32, %arg1: i32) -> (i32, i32) {
    %c0_i32 = arith.constant 0 : i32
    %c0_i32_0 = arith.constant 0 : i32
    %c0_i32_1 = arith.constant 0 : i32
    return %c0_i32, %c0_i32_0 : i32, i32
  }
  func.func @transform_2(%arg0: i32, %arg1: i32) -> (i32, i32, i32) {
    %c0_i32 = arith.constant 0 : i32
    %c0_i32_0 = arith.constant 0 : i32
    return %arg0, %arg1, %c0_i32 : i32, i32, i32
  }
}

</mosaic_0001>

<bundles_post_ra>
// kernel: tpu_custom_call.1
= control target key start
LH: loop header
LB: loop body
LE: loop exit
PB: predicated region body
PF: predicated region fallthrough
CT: control target
= control target key end

     0   :  { %7 = vsyncpa [#allocation3], 0  ;;  %s1188_s0 = inlined_call_operand.hbm [shape: f32[2,8,16,32], index: 0, kind: input, shape index: {}]   ;;  %s1189_s1 = inlined_call_operand.hbm [shape: f32[32,64], index: 1, kind: input, shape index: {}]   ;;  %s1190_s2 = inlined_call_operand.hbm [shape: f32[2,16,512], index: 2, kind: output, shape index: {}]  }
   0x1   :  { %9 = vsyncpa [#allocation3 + $0x1], 0 }
   0x2   :  { %10 = vsyncpa [#allocation6], 0 }
   0x3   :  { %11 = vsyncpa [#allocation4], 0 }
   0x4   :  { %13 = vsyncpa [#allocation4 + $0x1], 0  ;;  %s920_s9 = smov 0   ;;  %s922_s10 = smov 0  }
   0x5   :  { %s924_s11 = smov 0   ;;  %s926_s12 = smov 0  }
   0x6   :  { %s928_s13 = smov 0   ;;  %s930_s14 = smov 0  }
   0x7 LB: > { %s574_s15 = sadd.s32 4294967295, %s895_s14   ;;  %s575_s16 = sadd.s32 4294967294, %s895_s14   ;;  %s895_s14 = sphi %s930_s14, %s19_s14   ;;  %s891_s13 = sphi %s928_s13, %s1214_s13   ;;  %s887_s12 = sphi %s926_s12, %s1213_s12   ;;  %s883_s11 = sphi %s924_s11, %s1212_s11   ;;  %s879_s10 = sphi %s922_s10, %s1211_s10   ;;  %s875_s9 = sphi %s920_s9, %s1210_s9  }
   0x8   : > { %p53_p0 = scmp.ne.s32.totalorder %s879_s10, %s875_s9  ;;  %p954_p1 = scmp.eq.s32.totalorder %s574_s15, 0 }
   0x9   : > { %p958_p2 = scmp.eq.s32.totalorder %s574_s15, 1  ;;  %p106_p3 = scmp.eq.s32.totalorder %s575_s16, 1 }
   0xa   : > { %s1195_s17 = scalar_select %p954_p1, 1, 0 }
   0xb   : > { %s1196_s18 = scalar_select %p958_p2, 1, 0 }
   0xc   : > { %p964_p4 = por %p954_p1, %p53_p0  ;;  %p576_p5 = scmp.ge.s32.totalorder %s895_s14, 1 }
   0xd   : > { %p969_p6 = por %p106_p3, %p53_p0  ;;  %p113_p7 = scmp.lt.s32.totalorder %s895_s14, 3 }
   0xe   : > { %s1197_s19 = scalar_select %p964_p4, 1, 0 }
   0xf   : > { %s1198_s20 = scalar_select %p969_p6, 1, 0 }
  0x10   : > { %p974_p8 = pnand %p576_p5, %p113_p7  ;;  %s897_s22 = smov [#allocation5]  }
  0x11   : > { %s125_s23 = sshll.u32 %s897_s22, 4  ;;  %s31_s25 = sadd.s32 1, %s891_s13  ;;  %s126_s23 = int_to_ptr.vmem [resolvable:$true] %s125_s23 }
  0x12   : > { %s1199_s21 = scalar_select %p974_p8, 1, 0 }
  0x13   : > { %p681_p9 = pneg %p974_p8  ;;  %s751_s28 = scalar_lea.hbm %s1189_s1, 512 }
  0x14   : > { %p752_p12 = scmp.ne.s32.totalorder %s1189_s1, %s751_s28  ;;  %p758_p5 = scmp.lt.u32.totalorder %s751_s28, %s1189_s1 }
  0x15   : > { %p983_p11 = pnand %p681_p9, %p954_p1 }
  0x17   : > { %p753_p13 = pneg %p983_p11 }
  0x19   : > { %p754_p0 = pnand %p753_p13, %p752_p12 }
  0x1b   : > { %p755_p3 = pneg %p754_p0 }
  0x1d   : > { %p760_p7 = pnand %p758_p5, %p755_p3 }
  0x1f   : > { %763 = shalt.err (!%p760_p7)
}
  0x20   : > { %s764_s5 = scalar_lea.vmem %s126_s23, 512  ;;  %p772_p1 = scmp.lt.s32.totalorder %s126_s23, %s126_s23 }
  0x21   : > { %p765_p9 = scmp.ne.s32.totalorder %s126_s23, %s764_s5  ;;  %p773_p4 = scmp.lt.s32.totalorder %s764_s5, %s764_s5 }
  0x23   : > { %p767_p10 = pnand %p765_p9, %p753_p13  ;;  %p774_p8 = por %p773_p4, %p772_p1 }
  0x25   : > { %p768_p6 = pneg %p767_p10 }
  0x27   : > { %p775_p2 = pnand %p774_p8, %p768_p6 }
  0x29   : > { %778 = shalt.err (!%p775_p2)
}
  0x2a   : > { %s898_s6 = smov 128   ;;  %s899_s7 = smov 8  }
  0x2b   : > { %684 = dma.hbm_to_vmem [thread:$0]  (!%p983_p11), %s1189_s1, 512, %s126_s23, [#allocation6], %s898_s6, %s898_s6, %s899_s7  }
  0x2c   : > { %p33_p1 = scmp.ge.s32.totalorder %s31_s25, 2  ;;  %s40_s16 = sadd.s32 1, %s883_s11 }
  0x2d   : > { %p47_p2 = scmp.ne.s32.totalorder %s883_s11, %s879_s10  ;;  %p48_p4 = scmp.eq.s32.totalorder %s895_s14, 0 }
  0x2e   : > { %s1216_s25 = smov (%p33_p1, %s31_s25), 0  ;;  %p1202_p8 = scmp.ne.s32.totalorder %s1196_s18, 0 }
  0x2f   : > { %p1013_p6 = por %p48_p4, %p47_p2  ;;  %s35_s26 = ssub.s32 %s891_s13, %s1216_s25 }
  0x30   : > { %p1019_p10 = por %p1202_p8, %p47_p2  ;;  %p694_p12 = scmp.lt.s32.totalorder %s895_s14, 2 }
  0x31   : > { %p38_p11 = scmp.eq.s32.totalorder %s35_s26, 0  ;;  %s139_s23 = sand.u32 1, %s883_s11  }
  0x32   : > { %s579_s27 = sshll.u32 %s139_s23, 7  ;;  %s607_s29 = sshll.u32 %s891_s13, 11 }
  0x33   : > { %s1028_s28 = scalar_select %p38_p11, %s883_s11, %s40_s16  }
  0x34   : > { %s1034_s4 = scalar_lea.hbm %s1188_s0, %s607_s29  ;;  %s143_s18 = scalar_lea.vmem [#allocation2], %s579_s27 }
  0x35   : > { %s152_s5 = sshll.u32 %s143_s18, 4  ;;  %p1040_p13 = pnand %p694_p12, %p1013_p6  ;;  %s1036_s5 = int_to_ptr.vmem [resolvable:$true] %s152_s5 }
  0x36   : > { %s1044_s15 = scalar_lea.sflag [#allocation3], %s139_s23  ;;  %s779_s16 = scalar_lea.hbm %s1034_s4, 2048 }
  0x37   : > { %p780_p0 = scmp.ne.s32.totalorder %s1034_s4, %s779_s16  ;;  %p781_p3 = pneg %p1040_p13 }
  0x38   : > { %s784_s22 = scalar_lea.hbm %s1188_s0, 4096  ;;  %p785_p9 = scmp.lt.u32.totalorder %s1034_s4, %s1188_s0 }
  0x39   : > { %p782_p5 = pnand %p781_p3, %p780_p0  ;;  %p786_p1 = scmp.lt.u32.totalorder %s784_s22, %s779_s16 }
  0x3a   : > { %p788_p4 = scmp.lt.u32.totalorder %s779_s16, %s1034_s4 }
  0x3b   : > { %p783_p7 = pneg %p782_p5  ;;  %p787_p2 = por %p786_p1, %p785_p9 }
  0x3d   : > { %p789_p6 = por %p788_p4, %p787_p2 }
  0x3f   : > { %p790_p8 = pnand %p789_p6, %p783_p7 }
  0x41   : > { %793 = shalt.err (!%p790_p8)
}
  0x42   : > { %s794_s23 = scalar_lea.vmem %s1036_s5, 2048  ;;  %s900_s3 = smov [#allocation2]  }
  0x43   : > { %p795_p12 = scmp.ne.s32.totalorder %s1036_s5, %s794_s23  ;;  %s799_s18 = sshll.u32 %s900_s3, 4  ;;  %s800_s18 = int_to_ptr.vmem [resolvable:$false] %s799_s18 }
  0x44   : > { %s801_s26 = scalar_lea.vmem %s800_s18, 4096  ;;  %p802_p5 = scmp.lt.s32.totalorder %s1036_s5, %s800_s18 }
  0x45   : > { %p797_p11 = pnand %p795_p12, %p781_p3  ;;  %p803_p9 = scmp.lt.s32.totalorder %s801_s26, %s794_s23 }
  0x47   : > { %p798_p0 = pneg %p797_p11  ;;  %p804_p1 = por %p803_p9, %p802_p5 }
  0x49   : > { %p805_p2 = pnand %p804_p1, %p798_p0 }
  0x4b   : > { %808 = shalt.err (!%p805_p2)
}
  0x4c   : > { %688 = dma.hbm_to_vmem [thread:$0]  (!%p1040_p13), %s1034_s4, 2048, %s1036_s5, %s1044_s15, %s898_s6, %s898_s6, %s899_s7  }
  0x4d   : > { %p1205_p3 = scmp.ne.s32.totalorder %s1199_s21, 0 }
  0x4e   : > { %s1078_s16 = sand.u32 (!%p1205_p3), 1, %s879_s10   ;;  %p1206_p7 = scmp.ne.s32.totalorder (!%p1205_p3), %s1197_s19, 0 }
  0x4f   : > { %164 = sbr.rel (%p1205_p3) target bundleno = 464 (0x1d0), region = 28  ;;  %s583_s27 = sshll.u32 (!%p1205_p3), %s1078_s16, 7 }
  0x50   : > { %s167_s22 = scalar_lea.sflag (!%p1205_p3), [#allocation3], %s1078_s16  ;;  %s1082_s29 = scalar_lea.vmem (!%p1205_p3), [#allocation2], %s583_s27 }
  0x56   : > { %862 = dma.done.wait (%p1206_p7), %s167_s22, 2048  }
  0x57   : > { %864 = vsyncadd (%p1206_p7), %s167_s22, 4294965248  ;;  %p1207_p13 = scmp.ne.s32.totalorder %s1195_s17, 0 }
  0x59   : > { %866 = dma.done.wait (%p1207_p13), [#allocation6], 512  }
  0x5a   : > { %868 = vsyncadd (%p1207_p13), [#allocation6], 4294966784  ;;  %vm217_vm0 = vcmask 261120   ;;  %v213_v0 = vld [vmem:[#allocation5] sm:$0xff]  ;;  %v214_v1 = vld [vmem:[#allocation5 + $0x8] sm:$0xff]  ;;  %s901_s17 = smov 64  }
  0x5b   : > { %v215_v2 = vld [vmem:[#allocation5 + $0x10] sm:$0xff]  ;;  %v661_v3 = vpack.c.bf16 %v214_v1, %v213_v0  ;;  %v216_v4 = vld [vmem:[#allocation5 + $0x18] sm:$0xff]  ;;  %v197_v5 = vld [vmem:[%s1082_s29] sm:$0xff]  ;;  %s585_s19 = sshll.u32 %s1078_s16, 6  ;;  %vm443_vm1 = vcmask 523264   ;;  %s608_s7 = sshll.u32 %s887_s12, 10 }
  0x5c   : > { %v205_v6 = vld [vmem:[%s1082_s29 + $0x40] sm:$0xff]  ;;  %v665_v7 = vpack.c.bf16 %v216_v4, %v215_v2  ;;  %637 = vmatprep.mubr.msk.f32.mxu0 %vm217_vm0, %v197_v5  ;;  %v198_v8 = vld [vmem:[%s1082_s29 + $0x8] sm:$0xff]  ;;  %v199_v10 = vld [vmem:[%s1082_s29 + $0x10] sm:$0xff]  ;;  %s194_s21 = scalar_lea.vmem [#allocation7], %s585_s19  ;;  %s1138_s8 = scalar_lea.hbm %s1190_s2, %s608_s7 }
  0x5d   : > { %649 = vmatprep.mubr.msk.f32.mxu1 %vm217_vm0, %v205_v6  ;;  %662 = vmatprep.subr.bf16.mxu0 %v661_v3  ;;  %v206_v9 = vld [vmem:[%s1082_s29 + $0x48] sm:$0xff]  ;;  %v207_v11 = vld [vmem:[%s1082_s29 + $0x50] sm:$0xff]  ;;  %v200_v12 = vld [vmem:[%s1082_s29 + $0x18] sm:$0xff]  ;;  %s477_s6 = sshll.u32 %s194_s21, 4  ;;  %s461_s12 = scalar_lea.sflag [#allocation4], %s1078_s16  ;;  %s1133_s6 = int_to_ptr.vmem [resolvable:$true] %s477_s6 }
  0x5e   : > { %669 = vmatprep.subr.bf16.mxu1 %v661_v3  ;;  %664 = vmatpush3.bf16.msra.mxu0 %v661_v3  ;;  %v208_v13 = vld [vmem:[%s1082_s29 + $0x58] sm:$0xff]  ;;  %v201_v14 = vld [vmem:[%s1082_s29 + $0x20] sm:$0xff]  ;;  %v202_v16 = vld [vmem:[%s1082_s29 + $0x28] sm:$0xff]  ;;  %s809_s15 = scalar_lea.vmem %s1133_s6, 1024  ;;  %s902_s30 = smov [#allocation7]  }
  0x5f   : > { %671 = vmatpush3.bf16.msra.mxu1 %v661_v3  ;;  %666 = vmatprep.subr.bf16.mxu0 %v665_v7  ;;  %v209_v15 = vld [vmem:[%s1082_s29 + $0x60] sm:$0xff]  ;;  %v210_v17 = vld [vmem:[%s1082_s29 + $0x68] sm:$0xff]  ;;  %v203_v18 = vld [vmem:[%s1082_s29 + $0x30] sm:$0xff]  ;;  %p810_p4 = scmp.ne.s32.totalorder %s1133_s6, %s809_s15  ;;  %s813_s23 = sshll.u32 %s902_s30, 4  ;;  %s814_s23 = int_to_ptr.vmem [resolvable:$false] %s813_s23 }
  0x60   : > { %670 = vmatprep.subr.bf16.mxu1 %v665_v7  ;;  %v211_v19 = vld [vmem:[%s1082_s29 + $0x70] sm:$0xff]  ;;  %v204_v20 = vld [vmem:[%s1082_s29 + $0x38] sm:$0xff]  ;;  %s815_s3 = scalar_lea.vmem %s814_s23, 2048  ;;  %p816_p12 = scmp.lt.s32.totalorder %s1133_s6, %s814_s23 }
  0x61   : > { %v212_v21 = vld [vmem:[%s1082_s29 + $0x78] sm:$0xff]  ;;  %p811_p6 = pnand %p810_p4, %p1019_p10  ;;  %p817_p11 = scmp.lt.s32.totalorder %s815_s3, %s809_s15 }
  0x62   : > { %668 = vmatpush3.bf16.msra.mxu0 %v665_v7 }
  0x63   : > { %672 = vmatpush3.bf16.msra.mxu1 %v665_v7  ;;  %p812_p8 = pneg %p811_p6  ;;  %p818_p0 = por %p817_p11, %p816_p12 }
  0x65   : > { %638 = vmatmul.mubr.msk.f32.vlgmr.msra.gmra.mrb[0].mxu0 %vm217_vm0, %v198_v8  ;;  %p819_p5 = pnand %p818_p0, %p812_p8 }
  0x66   : > { %650 = vmatmul.mubr.msk.f32.vlgmr.msra.gmra.mrb[0].mxu1 %vm217_vm0, %v206_v9  ;;  %640 = vmatprep.mubr.msk.f32.mxu0 %vm217_vm0, %v199_v10 }
  0x67   : > { %652 = vmatprep.mubr.msk.f32.mxu1 %vm217_vm0, %v207_v11 }
  0x69   : > { %641 = vmatmul.mubr.msk.f32.gmra.mrb[2].mxu0 %vm217_vm0, %v200_v12 }
  0x6a   : > { %653 = vmatmul.mubr.msk.f32.gmra.mrb[2].mxu1 %vm217_vm0, %v208_v13  ;;  %643 = vmatprep.mubr.msk.f32.mxu0 %vm217_vm0, %v201_v14 }
  0x6b   : > { %655 = vmatprep.mubr.msk.f32.mxu1 %vm217_vm0, %v209_v15 }
  0x6d   : > { %644 = vmatmul.mubr.msk.f32.gmra.mrb[4].mxu0 %vm217_vm0, %v202_v16 }
  0x6e   : > { %656 = vmatmul.mubr.msk.f32.gmra.mrb[4].mxu1 %vm217_vm0, %v210_v17  ;;  %646 = vmatprep.mubr.msk.f32.mxu0 %vm217_vm0, %v203_v18 }
  0x6f   : > { %658 = vmatprep.mubr.msk.f32.mxu1 %vm217_vm0, %v211_v19 }
  0x71   : > { %647 = vmatmul.mubr.msk.f32.gmra.mrb[6].mxu0 %vm217_vm0, %v204_v20 }
  0x72   : > { %659 = vmatmul.mubr.msk.f32.gmra.mrb[6].mxu1 %vm217_vm0, %v212_v21 }
 0x138   : > { %v639_v22 = vpop.f32.mrb[0].mxu0 }
 0x139   : > { %v651_v23 = vpop.f32.mrb[0].mxu1  ;;  %v332_v24 = vpop.f32.mrb[1].mxu0 }
 0x13a   : > { %v372_v25 = vpop.f32.mrb[1].mxu1 }
 0x13c   : > { %v642_v26 = vpop.f32.mrb[2].mxu0 }
 0x13d   : > { %v654_v27 = vpop.f32.mrb[2].mxu1  ;;  %415 = vrot.lane.b32.xlu0 %v642_v26, %s901_s17  ;;  %v342_v28 = vpop.f32.mrb[3].mxu0 }
 0x13e   : > { %431 = vrot.lane.b32.xlu1 %v654_v27, %s901_s17  ;;  %v382_v29 = vpop.f32.mrb[3].mxu1 }
 0x140   : > { %v645_v30 = vpop.f32.mrb[4].mxu0 }
 0x141   : > { %v657_v31 = vpop.f32.mrb[4].mxu1  ;;  %413 = vrot.lane.b32.xlu0 %v342_v28, %s901_s17  ;;  %v352_v32 = vpop.f32.mrb[5].mxu0 }
 0x142   : > { %v392_v33 = vpop.f32.mrb[5].mxu1 }
 0x144   : > { %v648_v34 = vpop.f32.mrb[6].mxu0 }
 0x145   : > { %v660_v35 = vpop.f32.mrb[6].mxu1  ;;  %429 = vrot.lane.b32.xlu0 %v382_v29, %s901_s17  ;;  %423 = vrot.lane.b32.xlu1 %v648_v34, %s901_s17  ;;  %v362_v36 = vpop.f32.mrb[7].mxu0 }
 0x146   : > { %v402_v37 = vpop.f32.mrb[7].mxu1 }
 0x149   : > { %437 = vrot.lane.b32.xlu0 %v402_v37, %s901_s17  ;;  %421 = vrot.lane.b32.xlu1 %v362_v36, %s901_s17 }
 0x14d   : > { %439 = vrot.lane.b32.xlu1 %v660_v35, %s901_s17 }
 0x1af   : > { %v416_v39 = vpop.permute.xlu0 %415 }
 0x1b0   : > { %v432_v38 = vpop.permute.xlu1 %431  ;;  %v445_v41 = vsel %vm443_vm1, %v639_v22, %v416_v39 }
 0x1b1   : > { %v449_v40 = vsel %vm443_vm1, %v651_v23, %v432_v38  ;;  %456 = vst [vmem:[%s194_s21 + $0x20] sm:$0xff] %v445_v41 }
 0x1b2   : > { %458 = vst [vmem:[%s194_s21 + $0x30] sm:$0xff] %v449_v40 }
 0x1b3   : > { %v414_v42 = vpop.permute.xlu0 %413 }
 0x1b4   : > { %v444_v43 = vsel %vm443_vm1, %v332_v24, %v414_v42 }
 0x1b5   : > { %452 = vst [vmem:[%s194_s21] sm:$0xff] %v444_v43 }
 0x1b7   : > { %v430_v44 = vpop.permute.xlu0 %429  ;;  %v424_v45 = vpop.permute.xlu1 %423 }
 0x1b8   : > { %v448_v46 = vsel %vm443_vm1, %v372_v25, %v430_v44  ;;  %v447_v47 = vsel %vm443_vm1, %v645_v30, %v424_v45 }
 0x1b9   : > { %454 = vst [vmem:[%s194_s21 + $0x10] sm:$0xff] %v448_v46  ;;  %457 = vst [vmem:[%s194_s21 + $0x28] sm:$0xff] %v447_v47 }
 0x1bb   : > { %v438_v48 = vpop.permute.xlu0 %437  ;;  %v422_v49 = vpop.permute.xlu1 %421 }
 0x1bc   : > { %v450_v50 = vsel %vm443_vm1, %v392_v33, %v438_v48  ;;  %v446_v51 = vsel %vm443_vm1, %v352_v32, %v422_v49 }
 0x1bd   : > { %455 = vst [vmem:[%s194_s21 + $0x18] sm:$0xff] %v450_v50  ;;  %453 = vst [vmem:[%s194_s21 + $0x8] sm:$0xff] %v446_v51 }
 0x1bf   : > { %v440_v52 = vpop.permute.xlu1 %439 }
 0x1c0   : > { %v451_v53 = vsel %vm443_vm1, %v657_v31, %v440_v52 }
 0x1c1   : > { %459 = vst [vmem:[%s194_s21 + $0x38] sm:$0xff] %v451_v53 }
 0x1c2   : > { %822 = shalt.err (!%p819_p5)
}
 0x1c3   : > { %s823_s18 = scalar_lea.hbm %s1138_s8, 1024  ;;  %s827_s22 = scalar_lea.hbm %s1190_s2, 2048 }
 0x1c4   : > { %p824_p9 = scmp.ne.s32.totalorder %s1138_s8, %s823_s18  ;;  %p828_p3 = scmp.lt.u32.totalorder %s1138_s8, %s1190_s2 }
 0x1c5   : > { %p829_p7 = scmp.lt.u32.totalorder %s827_s22, %s823_s18  ;;  %p831_p4 = scmp.lt.u32.totalorder %s823_s18, %s1138_s8 }
 0x1c6   : > { %p825_p1 = pnand %p824_p9, %p1019_p10 }
 0x1c7   : > { %p830_p13 = por %p829_p7, %p828_p3 }
 0x1c8   : > { %p826_p2 = pneg %p825_p1 }
 0x1c9   : > { %p832_p6 = por %p831_p4, %p830_p13 }
 0x1cb   : > { %p833_p8 = pnand %p832_p6, %p826_p2 }
 0x1cd   : > { %836 = shalt.err (!%p833_p8)
}
 0x1ce   : > { %s903_s19 = smov 512   ;;  %s904_s21 = smov 32  }
 0x1cf   : > { %679 = dma.vmem_to_hbm [thread:$0]  (%p1019_p10), %s1133_s6, 1024, %s1138_s8, %s461_s12, %s903_s19, %s903_s19, %s904_s21  }
 0x1d0 PF: > { %s492_s7 = sand.u32 1, %s875_s9   ;;  %p1208_p12 = scmp.ne.s32.totalorder %s1198_s20, 0 }
 0x1d1   : > { %p1209_p11 = scmp.ge.s32.totalorder %s895_s14, 2  ;;  %s493_s4 = scalar_lea.sflag [#allocation4], %s492_s7 }
 0x1d3   : > { %p690_p0 = pnand %p1209_p11, %p1208_p12 }
 0x1d5   : > { %870 = dma.done.wait (!%p690_p0), %s493_s4, 1024  }
 0x1d6   : > { %872 = vsyncadd (!%p690_p0), %s493_s4, 4294966272  ;;  %s19_s14 = sadd.s32 1, %s895_s14   ;;  %s1210_s9 = smov %s879_s10 }
 0x1d7   : > { %p16_p5 = scmp.ge.s32.totalorder %s19_s14, 4   ;;  %s1211_s10 = smov %s883_s11 }
 0x1d8   : > { %s1212_s11 = smov %s1028_s28  ;;  %s1213_s12 = smov %s891_s13 }
 0x1d9   : > { %s1214_s13 = smov %s1216_s25  ;;  %18 = sbr.rel (!%p16_p5) target bundleno = 7 (0x7), region = 77 }
 0x1e0   :  { %498 = vsyncpa [#allocation3], 1 }
 0x1e1   :  { %500 = vsyncpa [#allocation3 + $0x1], 1 }
 0x1e2   :  { %501 = vsyncpa [#allocation6], 1 }
 0x1e3   :  { %502 = vsyncpa [#allocation4], 1 }
 0x1e4   :  { %504 = vsyncpa [#allocation4 + $0x1], 1 }

</bundles_post_ra>
